<compile_context>
chip_gen: v5e
topology: v5e:2x2
jax: 0.10.0
libtpu: 0.0.40
codegen_flags: <defaults>
</compile_context>

<pallas_src>
import functools

import jax
import jax.numpy as jnp
from jax.experimental import pallas as pl
from jax.experimental.pallas import tpu as pltpu


def _round_up(n, m):
    return (n + m - 1) // m * m


def _layernorm_kernel(x_ref, g_ref, b_ref, o_ref, *, eps):
    # Cast to f32 on load; all statistics in f32 regardless of input dtype.
    x = x_ref[...].astype(jnp.float32)                     # (rows, D)
    d = x.shape[-1]
    mean = jnp.mean(x, axis=-1, keepdims=True)             # (rows, 1)
    diff = x - mean
    var = jnp.sum(diff * diff, axis=-1, keepdims=True) * (1.0 / (d - 1))
    std = jnp.sqrt(var)                                    # unbiased std (torch x.std)
    s = std + eps
    inv = pl.reciprocal(s, approx=True)                    # EUP slot (frees VALU)
    inv = inv * (2.0 - s * inv)                            # 1 Newton step -> ~f32 exact
    out = g_ref[...] * (diff * inv) + b_ref[...]           # f32 math
    o_ref[...] = out.astype(o_ref.dtype)                   # cast back at the store


def layer_norm(x, gamma, beta, *, eps=1e-6, target_block_bytes=2 << 20):
    """a_2 * (x - mean) / (std + eps) + b_2 over the last dim; any leading shape."""
    orig_shape = x.shape
    d = orig_shape[-1]
    x2 = x.reshape(-1, d)            # metadata-only reshape; original dtype kept
    n = x2.shape[0]
    itemsize = jnp.dtype(x2.dtype).itemsize

    # Sublane multiple for the row dim of the block (packed dtypes need more).
    row_mult = max(8, 32 // itemsize)

    # Row block from a bytes budget: ~target_block_bytes of input per block so
    # double-buffered in + out (~4x that) fits every generation's default
    # scoped VMEM (16 MiB on v5e, 32 MiB on v6e/v7x).
    bytes_per_row = d * itemsize
    br = max(row_mult,
             (target_block_bytes // bytes_per_row) // row_mult * row_mult)
    br = min(br, 2048)
    # Guarantee >=2 row blocks when there is enough work so the "parallel"
    # grid axis can shard across v7x's two TensorCores.
    if n > row_mult:
        br = min(br, _round_up(-(-n // 2), row_mult))
    br = max(br, row_mult)

    grid = (pl.cdiv(n, br),)         # ragged last block handled by Pallas

    g2 = gamma.reshape(1, d).astype(jnp.float32)
    b2 = beta.reshape(1, d).astype(jnp.float32)

    out = pl.pallas_call(
        functools.partial(_layernorm_kernel, eps=eps),
        out_shape=jax.ShapeDtypeStruct((n, d), x2.dtype),
        grid=grid,
        in_specs=[pl.BlockSpec((br, d), lambda i: (i, 0)),    # x rows
                  pl.BlockSpec((1, d), lambda i: (0, 0)),     # gamma (a_2)
                  pl.BlockSpec((1, d), lambda i: (0, 0))],    # beta  (b_2)
        out_specs=pl.BlockSpec((br, d), lambda i: (i, 0)),
        compiler_params=pltpu.CompilerParams(
            dimension_semantics=("parallel",)),
    )(x2, g2, b2)

    return out.reshape(orig_shape)


def layer_norm_ref(x, gamma, beta, eps=1e-6):
    """Pure-JAX reference with identical (torch) semantics, in f32."""
    x = x.astype(jnp.float32)
    mean = jnp.mean(x, axis=-1, keepdims=True)
    var = jnp.sum((x - mean) ** 2, axis=-1, keepdims=True) / (x.shape[-1] - 1)
    std = jnp.sqrt(var)
    return gamma.astype(jnp.float32) * (x - mean) / (std + eps) + beta.astype(jnp.float32)


if __name__ == "__main__":
    key = jax.random.PRNGKey(0)
    k1, k2, k3, k4, k5 = jax.random.split(key, 5)

    # Shapes consistent with the module's usage: (batch, seq, hidden).
    B, L, D = 2, 8, 32
    x = jax.random.normal(k1, (B, L, D), dtype=jnp.float32)
    gamma = (jnp.ones((D,), jnp.float32)
             + 0.1 * jax.random.normal(k2, (D,), dtype=jnp.float32))
    beta = 0.1 * jax.random.normal(k3, (D,), dtype=jnp.float32)

    fn = jax.jit(layer_norm)
    out = jax.block_until_ready(fn(x, gamma, beta))
    assert out.shape == (B, L, D) and out.dtype == x.dtype
    assert bool(jnp.all(jnp.isfinite(out)))
    ref = layer_norm_ref(x, gamma, beta)
    assert bool(jnp.allclose(out, ref, rtol=1e-3, atol=1e-3)), \
        float(jnp.max(jnp.abs(out - ref)))

    # Row count not a multiple of the block -> exercises the ragged last block.
    x2 = jax.random.normal(k4, (3, 50, D), dtype=jnp.float32)
    out2 = jax.block_until_ready(jax.jit(layer_norm)(x2, gamma, beta))
    ref2 = layer_norm_ref(x2, gamma, beta)
    assert bool(jnp.allclose(out2, ref2, rtol=1e-3, atol=1e-3))

    # bf16 input, lane-dense D=128 -> exercises the in-kernel f32 cast path.
    D3 = 128
    x3 = jax.random.normal(k5, (4, 16, D3), dtype=jnp.bfloat16)
    g3 = jnp.ones((D3,), jnp.float32)
    b3 = jnp.zeros((D3,), jnp.float32)
    out3 = jax.block_until_ready(jax.jit(layer_norm)(x3, g3, b3))
    assert out3.dtype == jnp.bfloat16 and out3.shape == x3.shape
    ref3 = layer_norm_ref(x3, g3, b3)
    assert bool(jnp.allclose(out3.astype(jnp.float32), ref3, rtol=3e-2, atol=3e-2))

    print("KERNEL_OK")
</pallas_src>

<mosaic_0001>
module attributes {stable_mosaic.version = 11 : i64} {
  func.func @_layernorm_kernel(%arg0: i32, %arg1: memref<8x32xf32, #tpu.memory_space<vmem>>, %arg2: memref<1x32xf32, #tpu.memory_space<vmem>>, %arg3: memref<1x32xf32, #tpu.memory_space<vmem>>, %arg4: memref<8x32xf32, #tpu.memory_space<vmem>>) attributes {dimension_semantics = [#tpu.dimension_semantics<parallel>], iteration_bounds = array<i64: 2>, scalar_prefetch = 0 : i64, scratch_operands = 0 : i64, tpu.core_type = #tpu.core_type<tc>, window_params = [{transform_indices = @transform_0, window_bounds = array<i64: 8, 32>}, {pipeline_mode = #tpu.pipeline_mode<synchronous>, transform_indices = @transform_1, window_bounds = array<i64: 1, 32>}, {pipeline_mode = #tpu.pipeline_mode<synchronous>, transform_indices = @transform_2, window_bounds = array<i64: 1, 32>}, {transform_indices = @transform_3, window_bounds = array<i64: 8, 32>}]} {
    %c0 = arith.constant 0 : index
    %c0_0 = arith.constant 0 : index
    %0 = vector.load %arg1[%c0, %c0_0] : memref<8x32xf32, #tpu.memory_space<vmem>>, vector<8x32xf32>
    %cst = arith.constant dense<0.000000e+00> : vector<8xf32>
    %1 = vector.multi_reduction <add>, %0, %cst [1] : vector<8x32xf32> to vector<8xf32>
    %2 = vector.shape_cast %1 : vector<8xf32> to vector<8x1xf32>
    %cst_1 = arith.constant 3.200000e+01 : f32
    %3 = vector.broadcast %cst_1 : f32 to vector<8x1xf32>
    %4 = arith.divf %2, %3 : vector<8x1xf32>
    %5 = vector.broadcast %4 : vector<8x1xf32> to vector<8x32xf32>
    %6 = arith.subf %0, %5 : vector<8x32xf32>
    %7 = arith.mulf %6, %6 : vector<8x32xf32>
    %cst_2 = arith.constant dense<0.000000e+00> : vector<8xf32>
    %8 = vector.multi_reduction <add>, %7, %cst_2 [1] : vector<8x32xf32> to vector<8xf32>
    %9 = vector.shape_cast %8 : vector<8xf32> to vector<8x1xf32>
    %cst_3 = arith.constant 0.0322580636 : f32
    %10 = vector.broadcast %cst_3 : f32 to vector<8x1xf32>
    %11 = arith.mulf %9, %10 : vector<8x1xf32>
    %12 = math.sqrt %11 : vector<8x1xf32>
    %cst_4 = arith.constant 9.99999997E-7 : f32
    %13 = vector.broadcast %cst_4 : f32 to vector<8x1xf32>
    %14 = arith.addf %12, %13 : vector<8x1xf32>
    %15 = tpu.reciprocal %14 {approx = true} : vector<8x1xf32> -> vector<8x1xf32>
    %16 = arith.mulf %14, %15 : vector<8x1xf32>
    %cst_5 = arith.constant 2.000000e+00 : f32
    %17 = vector.broadcast %cst_5 : f32 to vector<8x1xf32>
    %18 = arith.subf %17, %16 : vector<8x1xf32>
    %19 = arith.mulf %15, %18 : vector<8x1xf32>
    %c0_6 = arith.constant 0 : index
    %c0_7 = arith.constant 0 : index
    %20 = vector.load %arg2[%c0_6, %c0_7] : memref<1x32xf32, #tpu.memory_space<vmem>>, vector<1x32xf32>
    %21 = vector.broadcast %19 : vector<8x1xf32> to vector<8x32xf32>
    %22 = arith.mulf %6, %21 : vector<8x32xf32>
    %23 = vector.broadcast %20 : vector<1x32xf32> to vector<8x32xf32>
    %24 = arith.mulf %23, %22 : vector<8x32xf32>
    %c0_8 = arith.constant 0 : index
    %c0_9 = arith.constant 0 : index
    %25 = vector.load %arg3[%c0_8, %c0_9] : memref<1x32xf32, #tpu.memory_space<vmem>>, vector<1x32xf32>
    %26 = vector.broadcast %25 : vector<1x32xf32> to vector<8x32xf32>
    %27 = arith.addf %24, %26 : vector<8x32xf32>
    %c0_10 = arith.constant 0 : index
    %c0_11 = arith.constant 0 : index
    %28 = vector.load %arg4[%c0_10, %c0_11] : memref<8x32xf32, #tpu.memory_space<vmem>>, vector<8x32xf32>
    tpu.vector_store %arg4[%c0_10, %c0_11], %27 {strides = array<i32>} : memref<8x32xf32, #tpu.memory_space<vmem>>, vector<8x32xf32>,
    return
  }
  func.func @transform_0(%arg0: i32) -> (i32, i32) {
    %c0_i32 = arith.constant 0 : i32
    %c0_i32_0 = arith.constant 0 : i32
    return %arg0, %c0_i32 : i32, i32
  }
  func.func @transform_1(%arg0: i32) -> (i32, i32) {
    %c0_i32 = arith.constant 0 : i32
    %c0_i32_0 = arith.constant 0 : i32
    %c0_i32_1 = arith.constant 0 : i32
    return %c0_i32, %c0_i32_0 : i32, i32
  }
  func.func @transform_2(%arg0: i32) -> (i32, i32) {
    %c0_i32 = arith.constant 0 : i32
    %c0_i32_0 = arith.constant 0 : i32
    %c0_i32_1 = arith.constant 0 : i32
    return %c0_i32, %c0_i32_0 : i32, i32
  }
  func.func @transform_3(%arg0: i32) -> (i32, i32) {
    %c0_i32 = arith.constant 0 : i32
    %c0_i32_0 = arith.constant 0 : i32
    return %arg0, %c0_i32 : i32, i32
  }
}

</mosaic_0001>

<bundles_post_ra>
// kernel: layer_norm.1
= control target key start
LH: loop header
LB: loop body
LE: loop exit
PB: predicated region body
PF: predicated region fallthrough
CT: control target
= control target key end

     0   :  { %8 = vsyncpa [#allocation3], 0  ;;  %s648_s0 = inlined_call_operand.hbm [shape: f32[16,32], index: 0, kind: input, shape index: {}]   ;;  %s649_s1 = inlined_call_operand.vmem [shape: f32[1,32], index: 1, kind: input, shape index: {}]   ;;  %s650_s2 = inlined_call_operand.vmem [shape: f32[1,32], index: 2, kind: input, shape index: {}]   ;;  %s651_s3 = inlined_call_operand.hbm [shape: f32[16,32], index: 3, kind: output, shape index: {}]  }
   0x1   :  { %10 = vsyncpa [#allocation3 + $0x1], 0 }
   0x2   :  { %11 = vsyncpa [#allocation4], 0 }
   0x3   :  { %13 = vsyncpa [#allocation4 + $0x1], 0  ;;  %s508_s12 = smov 0   ;;  %s510_s13 = smov 0  }
   0x4   :  { %s512_s14 = smov 0   ;;  %s514_s15 = smov 0  }
   0x5 LB: > { %s529_s16 = sadd.s32 4294967295, %s485_s15   ;;  %s322_s17 = sadd.s32 4294967294, %s485_s15   ;;  %s485_s15 = sphi %s514_s15, %s661_s15   ;;  %s481_s14 = sphi %s512_s14, %s660_s14   ;;  %s477_s13 = sphi %s510_s13, %s659_s13   ;;  %s473_s12 = sphi %s508_s12, %s658_s12  }
   0x6   : > { %s533_s18 = sadd.s32 1, %s485_s15   ;;  %s26_s19 = sadd.s32 1, %s481_s14 }
   0x7   : > { %s23_s20 = ssub.s32 %s485_s15, %s533_s18  ;;  %p33_p0 = scmp.ne.s32.totalorder %s481_s14, %s477_s13 }
   0x8   : > { %p24_p1 = scmp.eq.s32.totalorder %s23_s20, 0  ;;  %p34_p2 = scmp.eq.s32.totalorder %s485_s15, 0 }
   0x9   : > { %p39_p3 = scmp.ne.s32.totalorder %s477_s13, %s473_s12  ;;  %p40_p4 = scmp.eq.s32.totalorder %s529_s16, 0 }
   0xa   : > { %s545_s21 = scalar_select %p24_p1, %s481_s14, %s26_s19  }
   0xb   : > { %p547_p5 = por %p34_p2, %p33_p0  ;;  %p551_p6 = por %p40_p4, %p39_p3 }
   0xc   : > { %p105_p7 = scmp.eq.s32.totalorder %s529_s16, 1  ;;  %p111_p8 = scmp.eq.s32.totalorder %s322_s17, 1 }
   0xd   : > { %p346_p10 = scmp.lt.s32.totalorder %s485_s15, 2  ;;  %s137_s26 = sand.u32 1, %s481_s14  }
   0xe   : > { %p558_p11 = por %p105_p7, %p33_p0  ;;  %p562_p12 = por %p111_p8, %p39_p3 }
   0xf   : > { %s326_s27 = sshll.u32 %s485_s15, 3  ;;  %s325_s28 = sshll.u32 %s137_s26, 3 }
  0x10   : > { %s145_s4 = scalar_lea.hbm %s648_s0, %s326_s27  ;;  %s141_s6 = scalar_lea.vmem [#allocation2], %s325_s28 }
  0x11   : > { %s147_s5 = sshll.u32 %s145_s4, 4  ;;  %s149_s7 = sshll.u32 %s141_s6, 4  ;;  %s148_s5 = int_to_ptr.hbm [resolvable:$true] %s147_s5  ;;  %s150_s7 = int_to_ptr.vmem [resolvable:$true] %s149_s7 }
  0x12   : > { %p573_p13 = pnand %p346_p10, %p547_p5  ;;  %p327_p0 = scmp.ge.s32.totalorder %s485_s15, 1 }
  0x13   : > { %p154_p1 = scmp.lt.s32.totalorder %s485_s15, 3  ;;  %s138_s9 = scalar_lea.sflag [#allocation3], %s137_s26 }
  0x14   : > { %s389_s10 = sshra.s32 %s148_s5, 4  ;;  %p393_p3 = pneg %p573_p13  ;;  %s390_s10 = int_to_ptr.hbm [resolvable:$true] %s389_s10 }
  0x15   : > { %s391_s11 = scalar_lea.hbm %s390_s10, 8  ;;  %s396_s20 = scalar_lea.hbm %s648_s0, 16 }
  0x16   : > { %p392_p2 = scmp.ne.s32.totalorder %s390_s10, %s391_s11  ;;  %p397_p5 = scmp.lt.s32.totalorder %s390_s10, %s648_s0 }
  0x17   : > { %p398_p8 = scmp.lt.s32.totalorder %s396_s20, %s391_s11 }
  0x18   : > { %p394_p4 = pnand %p393_p3, %p392_p2 }
  0x19   : > { %p399_p10 = por %p398_p8, %p397_p5 }
  0x1a   : > { %p395_p7 = pneg %p394_p4 }
  0x1c   : > { %p400_p9 = pnand %p399_p10, %p395_p7 }
  0x1e   : > { %403 = shalt.err (!%p400_p9)
}
  0x1f   : > { %341 = dma.hbm_to_vmem [thread:$0]  (!%p573_p13), %s148_s5, 128, %s150_s7, %s138_s9  }
  0x20   : > { %p155_p2 = pnand %p327_p0, %p154_p1 }
  0x21   : > { %s594_s26 = sand.u32 (!%p155_p2), 1, %s477_s13  }
  0x22   : > { %158 = sbr.rel (%p155_p2) target bundleno = 328 (0x148), region = 32  ;;  %s328_s28 = sshll.u32 (!%p155_p2), %s594_s26, 3 }
  0x23   : > { %s161_s29 = scalar_lea.sflag (!%p155_p2), [#allocation3], %s594_s26  ;;  %s164_s30 = scalar_lea.vmem (!%p155_p2), [#allocation2], %s328_s28 }
  0x27   : > { %464 = dma.done.wait (%p551_p6), %s161_s29, 128  }
  0x28   : > { %466 = vsyncadd (%p551_p6), %s161_s29, 4294967168  ;;  %vm189_vm0 = vcmask 261120   ;;  %v188_v0 = vld [vmem:[%s164_s30] sm:$0xff]  ;;  %v487_v2 = vmov 32.0   ;;  %s331_s23 = sshll.u32 %s529_s16, 3  ;;  %s187_s11 = scalar_lea.vmem [#allocation5], %s328_s28 }
  0x29   : > { %v190_v1 = vsel %vm189_vm0, %v188_v0, 0.0  ;;  %383 = vrcp.f32 %v487_v2  ;;  %v381_v31 = vld [vmem:[%s649_s1] ss:$0 sm:$0xff]  ;;  %s247_s8 = scalar_lea.hbm %s651_s3, %s331_s23  ;;  %s249_s17 = sshll.u32 %s187_s11, 4  ;;  %s250_s17 = int_to_ptr.vmem [resolvable:$true] %s249_s17 }
  0x2a   : > { %191 = vadd.xlane.f32.xlu0 %v190_v1  ;;  %v382_v33 = vld [vmem:[%s650_s2] ss:$0 sm:$0xff]  ;;  %s251_s16 = sshll.u32 %s247_s8, 4  ;;  %s237_s19 = scalar_lea.sflag [#allocation4], %s594_s26  ;;  %s252_s16 = int_to_ptr.hbm [resolvable:$true] %s251_s16 }
  0x2b   : > { %s433_s20 = sshra.s32 %s252_s16, 4  ;;  %s439_s28 = scalar_lea.hbm %s651_s3, 16  ;;  %s434_s20 = int_to_ptr.hbm [resolvable:$true] %s433_s20 }
  0x2c   : > { %s435_s22 = scalar_lea.hbm %s434_s20, 8  ;;  %p440_p0 = scmp.lt.s32.totalorder %s434_s20, %s651_s3 }
  0x2d   : > { %p436_p6 = scmp.ne.s32.totalorder %s434_s20, %s435_s22  ;;  %p441_p1 = scmp.lt.s32.totalorder %s439_s28, %s435_s22 }
  0x2f   : > { %v384_v3 = vpop.eup %383  ;;  %p437_p9 = pnand %p436_p6, %p558_p11  ;;  %p442_p3 = por %p441_p1, %p440_p0 }
  0x30   : > { %v194_v4 = vmul.f32 32.0, %v384_v3  ;;  %vm198_vm1 = vweird.f32 %v384_v3 }
  0x31   : > { %p438_p13 = pneg %p437_p9 }
  0x32   : > { %v195_v5 = vsub.f32 1.0, %v194_v4 }
  0x33   : > { %p443_p4 = pnand %p442_p3, %p438_p13 }
  0x34   : > { %v196_v6 = vmul.f32 %v384_v3, %v195_v5 }
  0x36   : > { %v197_v7 = vadd.f32 %v384_v3, %v196_v6 }
  0x38   : > { %v199_v8 = vsel %vm198_vm1, %v384_v3, %v197_v7 }
  0x9d   : > { %v192_v9 = vpop.xlane.xlu0 %191 }
  0x9e   : > { %v200_v10 = vmul.f32 %v199_v8, %v192_v9 }
  0xa0   : > { %v201_v11 = vsub.f32 %v188_v0, %v200_v10 }
  0xa2   : > { %v202_v12 = vmul.f32 %v201_v11, %v201_v11 }
  0xa4   : > { %v203_v13 = vsel %vm189_vm0, %v202_v12, 0.0 }
  0xa5   : > { %204 = vadd.xlane.f32.xlu0 %v203_v13 }
 0x118   : > { %v205_v14 = vpop.xlane.xlu0 %204 }
 0x119   : > { %v206_v15 = vmul.f32 0.032258064, %v205_v14 }
 0x11b   : > { %385 = vrsqrt.f32 %v206_v15  ;;  %vm214_vm2 = vcmp.eq.f32.partialorder %v206_v15, inf  ;;  %v217_v23 = vand.u32 2147483648, %v206_v15  ;;  %vm216_vm3 = vcmp.eq.f32.partialorder %v206_v15, 0.0 }
 0x121   : > { %v386_v16 = vpop.eup %385 }
 0x122   : > { %v208_v17 = vmul.f32 %v386_v16, %v206_v15 }
 0x124   : > { %v209_v18 = vmul.f32 %v386_v16, %v208_v17 }
 0x126   : > { %v210_v19 = vmul.f32 0.5, %v209_v18 }
 0x128   : > { %v211_v20 = vsub.f32 1.5, %v210_v19 }
 0x12a   : > { %v212_v21 = vmul.f32 %v386_v16, %v211_v20 }
 0x12c   : > { %v213_v22 = vmul.f32 %v212_v21, %v206_v15 }
 0x12e   : > { %v215_v24 = vsel %vm214_vm2, %v206_v15, %v213_v22 }
 0x12f   : > { %v218_v25 = vsel %vm216_vm3, %v217_v23, %v215_v24 }
 0x130   : > { %v219_v26 = vadd.f32 1e-06, %v218_v25 }
 0x132   : > { %387 = vrcp.f32 %v219_v26 }
 0x138   : > { %v388_v27 = vpop.eup %387 }
 0x139   : > { %v221_v28 = vmul.f32 %v388_v27, %v219_v26 }
 0x13b   : > { %v222_v29 = vsub.f32 2.0, %v221_v28 }
 0x13d   : > { %v223_v30 = vmul.f32 %v388_v27, %v222_v29 }
 0x13f   : > { %v225_v32 = vmul.f32 %v223_v30, %v201_v11 }
 0x141   : > { %v229_v34 = vmul.f32 %v381_v31, %v225_v32 }
 0x143   : > { %v234_v35 = vadd.f32 %v382_v33, %v229_v34 }
 0x145   : > { %235 = vst.msk [vmem:[%s187_s11] sm:$0xff] %vm189_vm0, %v234_v35 }
 0x146   : > { %446 = shalt.err (!%p443_p4)
}
 0x147   : > { %336 = dma.vmem_to_hbm [thread:$0]  (%p558_p11), %s250_s17, 128, %s252_s16, %s237_s19  }
 0x148 PF: > { %s263_s26 = sand.u32 1, %s473_s12   ;;  %p657_p7 = scmp.ge.s32.totalorder %s485_s15, 2 }
 0x149   : > { %s264_s4 = scalar_lea.sflag [#allocation4], %s263_s26 }
 0x14a   : > { %p343_p5 = pnand %p657_p7, %p562_p12 }
 0x14c   : > { %p344_p8 = pneg %p343_p5 }
 0x14e   : > { %468 = dma.done.wait (%p344_p8), %s264_s4, 128  }
 0x14f   : > { %470 = vsyncadd (%p344_p8), %s264_s4, 4294967168  ;;  %p16_p10 = scmp.ge.s32.totalorder %s533_s18, 4   ;;  %s658_s12 = smov %s477_s13 }
 0x150   : > { %s659_s13 = smov %s481_s14  ;;  %s660_s14 = smov %s545_s21 }
 0x151   : > { %s661_s15 = smov %s533_s18  ;;  %18 = sbr.rel (!%p16_p10) target bundleno = 5 (0x5), region = 77 }
 0x156   :  { %270 = vsyncpa [#allocation3], 1 }
 0x157   :  { %272 = vsyncpa [#allocation3 + $0x1], 1 }
 0x158   :  { %273 = vsyncpa [#allocation4], 1 }
 0x159   :  { %275 = vsyncpa [#allocation4 + $0x1], 1 }

</bundles_post_ra>
